<compile_context>
chip_gen: v7x
topology: tpu7x:2x2x1
jax: 0.10.0
libtpu: 0.0.40
codegen_flags: <defaults>
</compile_context>

<pallas_src>
import jax
import jax.numpy as jnp
from jax.experimental import pallas as pl
from jax.experimental.pallas import tpu as pltpu


def _round_up(x, m):
    return ((x + m - 1) // m) * m


# --------------------------------------------------------------------------
# Parameter construction
# --------------------------------------------------------------------------
def init_mlp_params(key, in_dim, out_dim, hidden_layers):
    """Deterministic MLP params: list of (W, b) with W:(in,out), b:(1,out), f32."""
    sizes = [in_dim] + list(hidden_layers) + [out_dim]
    params = []
    for i in range(len(sizes) - 1):
        key, kw, kb = jax.random.split(key, 3)
        bound = 1.0 / jnp.sqrt(sizes[i])
        w = jax.random.uniform(kw, (sizes[i], sizes[i + 1]), jnp.float32,
                               minval=-bound, maxval=bound)
        b = jax.random.uniform(kb, (1, sizes[i + 1]), jnp.float32,
                               minval=-bound, maxval=bound)
        params.append((w, b))
    return params, key


def fuse_dueling_params(value_params, adv_params, action_dim):
    """Fuse the two streams into a single MLP and fold the dueling combine.

    Requires both streams to have the same number of Linear layers.
    Returns a list of (W, b) in f32; W layouts:
      layer 0      : (obs_dim, Hv0 + Ha0)    [Wv | Wa]
      hidden layer : (Hv+Ha, Hv'+Ha')        block-diagonal
      final layer  : (Hv+Ha, action_dim)     dueling combine folded in
    Hidden widths are then zero-padded up to multiples of 128 lanes (exact:
    padded activations are ReLU(0) = 0 and multiply zero rows downstream).
    """
    assert len(value_params) == len(adv_params), (
        "stream fusion requires equal depth")  # TODO(synk): general-depth path
    n = len(value_params)
    fused = []

    for li in range(n - 1):
        wv, bv = value_params[li]
        wa, ba = adv_params[li]
        if li == 0:
            w = jnp.concatenate([wv, wa], axis=1)
        else:
            z_tr = jnp.zeros((wv.shape[0], wa.shape[1]), wv.dtype)
            z_bl = jnp.zeros((wa.shape[0], wv.shape[1]), wa.dtype)
            w = jnp.concatenate(
                [jnp.concatenate([wv, z_tr], axis=1),
                 jnp.concatenate([z_bl, wa], axis=1)], axis=0)
        b = jnp.concatenate([bv, ba], axis=1)
        fused.append((w, b))

    # Final layer: fold  Q = v + a - a.sum(-1, keepdims)/A  into the weights.
    #   Q[:, j] = h_v @ wv[:, 0] + h_a @ (wa[:, j] - wa.sum(1)/A)
    #             + (bv + ba[j] - ba.sum()/A)
    wv, bv = value_params[-1]          # (Hv, 1), (1, 1)
    wa, ba = adv_params[-1]            # (Ha, A), (1, A)
    wa_c = wa - wa.sum(axis=1, keepdims=True) / action_dim
    ba_c = ba - ba.sum(axis=1, keepdims=True) / action_dim
    w_top = jnp.broadcast_to(wv, (wv.shape[0], action_dim))
    if n == 1:
        # No hidden layers: both streams read obs directly.
        w_q = w_top + wa_c
    else:
        w_q = jnp.concatenate([w_top, wa_c], axis=0)
    b_q = bv + ba_c                    # (1, A)
    fused.append((w_q, b_q))

    # Zero-pad every hidden width to a multiple of 128 lanes (native vreg width).
    for i in range(len(fused) - 1):
        w, b = fused[i]
        width = w.shape[1]
        pad = _round_up(width, 128) - width
        if pad:
            fused[i] = (jnp.pad(w, ((0, 0), (0, pad))),
                        jnp.pad(b, ((0, 0), (0, pad))))
            w_next, b_next = fused[i + 1]
            fused[i + 1] = (jnp.pad(w_next, ((0, pad), (0, 0))), b_next)
    return fused


# --------------------------------------------------------------------------
# Kernel
# --------------------------------------------------------------------------
def _make_fused_kernel(n_layers):
    """Ref order: obs, [W0, b0, W1, b1, ...], out."""

    def kernel(*refs):
        obs_ref = refs[0]
        out_ref = refs[-1]
        h = obs_ref[...]                                    # f32 (tile_b, obs_dim)
        idx = 1
        for li in range(n_layers):
            w = refs[idx][...]                              # f32, VMEM-resident
            b = refs[idx + 1][...]                          # f32 (1, width)
            idx += 2
            h = jnp.dot(h, w, preferred_element_type=jnp.float32) + b
            if li < n_layers - 1:
                h = jnp.maximum(h, 0.0)                     # ReLU
        out_ref[...] = h.astype(out_ref.dtype)              # true-width store

    return kernel


# --------------------------------------------------------------------------
# Wrapper
# --------------------------------------------------------------------------
_MIN_ROWS_PER_CORE = 256


def _choose_tile_b(batch, tile_b_max=2048):
    """Big tiles (tiny VMEM footprint), no over-padding for small batches,
    and >= 2 grid steps for large batches so v7x can use both TensorCores."""
    b8 = _round_up(max(batch, 8), 8)
    tile = min(tile_b_max, b8)
    if b8 >= 2 * _MIN_ROWS_PER_CORE:
        tile = min(tile, _round_up((b8 + 1) // 2, 8))
    return max(8, _round_up(tile, 8))


def dueling_forward(obs, value_params, adv_params, action_dim, tile_b=2048):
    """Fused DuelingNN forward: Q = v + a - a.sum(-1, keepdims=True)/A."""
    B, obs_dim = obs.shape

    fused = fuse_dueling_params(value_params, adv_params, action_dim)
    n_layers = len(fused)

    flat = []
    for w, b in fused:
        flat += [w.astype(jnp.float32), b.astype(jnp.float32)]

    tile = _choose_tile_b(B, tile_b)
    grid = (pl.cdiv(B, tile),)   # partial last block: OOB reads unused rows,
                                 # OOB writes are masked by Pallas.

    in_specs = [pl.BlockSpec((tile, obs_dim), lambda i: (i, 0))]
    for arr in flat:
        # Constant index_map: weights/biases fetched once, stay VMEM-resident.
        in_specs.append(pl.BlockSpec(arr.shape, lambda i: (0, 0)))
    out_spec = pl.BlockSpec((tile, action_dim), lambda i: (i, 0))

    out = pl.pallas_call(
        _make_fused_kernel(n_layers),
        out_shape=jax.ShapeDtypeStruct((B, action_dim), jnp.float32),
        grid_spec=pltpu.PrefetchScalarGridSpec(
            num_scalar_prefetch=0,
            grid=grid,
            in_specs=in_specs,
            out_specs=out_spec,
        ),
        compiler_params=pltpu.CompilerParams(
            dimension_semantics=("parallel",)),
    )(obs, *flat)

    return out


# --------------------------------------------------------------------------
# Pure-JAX reference (f32, un-fused) matching the PyTorch forward semantics.
# --------------------------------------------------------------------------
def dueling_reference(obs, value_params, adv_params, action_dim):
    def mlp(x, params):
        for i, (w, b) in enumerate(params):
            x = x @ w + b
            if i < len(params) - 1:
                x = jnp.maximum(x, 0.0)
        return x

    v = mlp(obs, value_params)                       # (B, 1)
    a = mlp(obs, adv_params)                         # (B, A)
    return v + a - a.sum(axis=-1).reshape(-1, 1) / action_dim


if __name__ == "__main__":
    # Small shapes consistent with the module's forward.
    batch = 8
    obs_dim = 16
    action_space_dim = 4
    value_layers = [32, 32]
    advantage_layers = [32, 32]

    key = jax.random.PRNGKey(0)
    key, k_obs = jax.random.split(key)
    obs = jax.random.normal(k_obs, (batch, obs_dim), jnp.float32)

    value_params, key = init_mlp_params(key, obs_dim, 1, value_layers)
    adv_params, key = init_mlp_params(key, obs_dim, action_space_dim,
                                      advantage_layers)

    out = dueling_forward(obs, value_params, adv_params, action_space_dim)
    out = jax.block_until_ready(out)
    ref = dueling_reference(obs, value_params, adv_params, action_space_dim)
    assert out.shape == (batch, action_space_dim)
    assert jnp.allclose(out, ref, atol=3e-2, rtol=3e-2), "mismatch vs reference"

    # Also exercise the partial-tile path (B not a multiple of 8 / tile).
    key, k_obs2 = jax.random.split(key)
    obs2 = jax.random.normal(k_obs2, (13, obs_dim), jnp.float32)
    out2 = jax.block_until_ready(
        dueling_forward(obs2, value_params, adv_params, action_space_dim))
    ref2 = dueling_reference(obs2, value_params, adv_params, action_space_dim)
    assert out2.shape == (13, action_space_dim)
    assert jnp.allclose(out2, ref2, atol=3e-2, rtol=3e-2), "mismatch (partial tile)"

    print("KERNEL_OK")
</pallas_src>

<mosaic_0001>
module attributes {stable_mosaic.version = 11 : i64} {
  func.func @kernel(%arg0: i32, %arg1: memref<8x16xf32, #tpu.memory_space<vmem>>, %arg2: memref<16x128xf32, #tpu.memory_space<vmem>>, %arg3: memref<1x128xf32, #tpu.memory_space<vmem>>, %arg4: memref<128x128xf32, #tpu.memory_space<vmem>>, %arg5: memref<1x128xf32, #tpu.memory_space<vmem>>, %arg6: memref<128x4xf32, #tpu.memory_space<vmem>>, %arg7: memref<1x4xf32, #tpu.memory_space<vmem>>, %arg8: memref<8x4xf32, #tpu.memory_space<vmem>>) attributes {dimension_semantics = [#tpu.dimension_semantics<parallel>], iteration_bounds = array<i64: 1>, scalar_prefetch = 0 : i64, scratch_operands = 0 : i64, tpu.core_type = #tpu.core_type<tc>, window_params = [{transform_indices = @transform_0, window_bounds = array<i64: 8, 16>}, {pipeline_mode = #tpu.pipeline_mode<synchronous>, transform_indices = @transform_1, window_bounds = array<i64: 16, 128>}, {pipeline_mode = #tpu.pipeline_mode<synchronous>, transform_indices = @transform_2, window_bounds = array<i64: 1, 128>}, {pipeline_mode = #tpu.pipeline_mode<synchronous>, transform_indices = @transform_3, window_bounds = array<i64: 128, 128>}, {pipeline_mode = #tpu.pipeline_mode<synchronous>, transform_indices = @transform_4, window_bounds = array<i64: 1, 128>}, {pipeline_mode = #tpu.pipeline_mode<synchronous>, transform_indices = @transform_5, window_bounds = array<i64: 128, 4>}, {pipeline_mode = #tpu.pipeline_mode<synchronous>, transform_indices = @transform_6, window_bounds = array<i64: 1, 4>}, {transform_indices = @transform_7, window_bounds = array<i64: 8, 4>}]} {
    %c0 = arith.constant 0 : index
    %c0_0 = arith.constant 0 : index
    %0 = vector.load %arg1[%c0, %c0_0] : memref<8x16xf32, #tpu.memory_space<vmem>>, vector<8x16xf32>
    %c0_1 = arith.constant 0 : index
    %c0_2 = arith.constant 0 : index
    %1 = vector.load %arg2[%c0_1, %c0_2] : memref<16x128xf32, #tpu.memory_space<vmem>>, vector<16x128xf32>
    %c0_3 = arith.constant 0 : index
    %c0_4 = arith.constant 0 : index
    %2 = vector.load %arg3[%c0_3, %c0_4] : memref<1x128xf32, #tpu.memory_space<vmem>>, vector<1x128xf32>
    %cst = arith.constant dense<0.000000e+00> : vector<8x128xf32>
    %3 = tpu.matmul %0, %1, %cst {dimension_numbers = #tpu.dot_dimension_numbers<[1], [0], [0], [1], [0, 0, 1, 1], [], []>} : vector<8x16xf32>, vector<16x128xf32>, vector<8x128xf32> -> vector<8x128xf32>
    %4 = vector.broadcast %2 : vector<1x128xf32> to vector<8x128xf32>
    %5 = arith.addf %3, %4 : vector<8x128xf32>
    %cst_5 = arith.constant 0.000000e+00 : f32
    %6 = vector.broadcast %cst_5 : f32 to vector<8x128xf32>
    %7 = arith.maximumf %5, %6 : vector<8x128xf32>
    %c0_6 = arith.constant 0 : index
    %c0_7 = arith.constant 0 : index
    %8 = vector.load %arg4[%c0_6, %c0_7] : memref<128x128xf32, #tpu.memory_space<vmem>>, vector<128x128xf32>
    %c0_8 = arith.constant 0 : index
    %c0_9 = arith.constant 0 : index
    %9 = vector.load %arg5[%c0_8, %c0_9] : memref<1x128xf32, #tpu.memory_space<vmem>>, vector<1x128xf32>
    %cst_10 = arith.constant dense<0.000000e+00> : vector<8x128xf32>
    %10 = tpu.matmul %7, %8, %cst_10 {dimension_numbers = #tpu.dot_dimension_numbers<[1], [0], [0], [1], [0, 0, 1, 1], [], []>} : vector<8x128xf32>, vector<128x128xf32>, vector<8x128xf32> -> vector<8x128xf32>
    %11 = vector.broadcast %9 : vector<1x128xf32> to vector<8x128xf32>
    %12 = arith.addf %10, %11 : vector<8x128xf32>
    %cst_11 = arith.constant 0.000000e+00 : f32
    %13 = vector.broadcast %cst_11 : f32 to vector<8x128xf32>
    %14 = arith.maximumf %12, %13 : vector<8x128xf32>
    %c0_12 = arith.constant 0 : index
    %c0_13 = arith.constant 0 : index
    %15 = vector.load %arg6[%c0_12, %c0_13] : memref<128x4xf32, #tpu.memory_space<vmem>>, vector<128x4xf32>
    %c0_14 = arith.constant 0 : index
    %c0_15 = arith.constant 0 : index
    %16 = vector.load %arg7[%c0_14, %c0_15] : memref<1x4xf32, #tpu.memory_space<vmem>>, vector<1x4xf32>
    %cst_16 = arith.constant dense<0.000000e+00> : vector<8x4xf32>
    %17 = tpu.matmul %14, %15, %cst_16 {dimension_numbers = #tpu.dot_dimension_numbers<[1], [0], [0], [1], [0, 0, 1, 1], [], []>} : vector<8x128xf32>, vector<128x4xf32>, vector<8x4xf32> -> vector<8x4xf32>
    %18 = vector.broadcast %16 : vector<1x4xf32> to vector<8x4xf32>
    %19 = arith.addf %17, %18 : vector<8x4xf32>
    %c0_17 = arith.constant 0 : index
    %c0_18 = arith.constant 0 : index
    %20 = vector.load %arg8[%c0_17, %c0_18] : memref<8x4xf32, #tpu.memory_space<vmem>>, vector<8x4xf32>
    tpu.vector_store %arg8[%c0_17, %c0_18], %19 {strides = array<i32>} : memref<8x4xf32, #tpu.memory_space<vmem>>, vector<8x4xf32>,
    return
  }
  func.func @transform_0(%arg0: i32) -> (i32, i32) {
    %c0_i32 = arith.constant 0 : i32
    %c0_i32_0 = arith.constant 0 : i32
    return %arg0, %c0_i32 : i32, i32
  }
  func.func @transform_1(%arg0: i32) -> (i32, i32) {
    %c0_i32 = arith.constant 0 : i32
    %c0_i32_0 = arith.constant 0 : i32
    %c0_i32_1 = arith.constant 0 : i32
    return %c0_i32, %c0_i32_0 : i32, i32
  }
  func.func @transform_2(%arg0: i32) -> (i32, i32) {
    %c0_i32 = arith.constant 0 : i32
    %c0_i32_0 = arith.constant 0 : i32
    %c0_i32_1 = arith.constant 0 : i32
    return %c0_i32, %c0_i32_0 : i32, i32
  }
  func.func @transform_3(%arg0: i32) -> (i32, i32) {
    %c0_i32 = arith.constant 0 : i32
    %c0_i32_0 = arith.constant 0 : i32
    %c0_i32_1 = arith.constant 0 : i32
    return %c0_i32, %c0_i32_0 : i32, i32
  }
  func.func @transform_4(%arg0: i32) -> (i32, i32) {
    %c0_i32 = arith.constant 0 : i32
    %c0_i32_0 = arith.constant 0 : i32
    %c0_i32_1 = arith.constant 0 : i32
    return %c0_i32, %c0_i32_0 : i32, i32
  }
  func.func @transform_5(%arg0: i32) -> (i32, i32) {
    %c0_i32 = arith.constant 0 : i32
    %c0_i32_0 = arith.constant 0 : i32
    %c0_i32_1 = arith.constant 0 : i32
    return %c0_i32, %c0_i32_0 : i32, i32
  }
  func.func @transform_6(%arg0: i32) -> (i32, i32) {
    %c0_i32 = arith.constant 0 : i32
    %c0_i32_0 = arith.constant 0 : i32
    %c0_i32_1 = arith.constant 0 : i32
    return %c0_i32, %c0_i32_0 : i32, i32
  }
  func.func @transform_7(%arg0: i32) -> (i32, i32) {
    %c0_i32 = arith.constant 0 : i32
    %c0_i32_0 = arith.constant 0 : i32
    return %arg0, %c0_i32 : i32, i32
  }
}

</mosaic_0001>

<bundles_post_ra>
// kernel: tpu_custom_call.1
= control target key start
LH: loop header
LB: loop body
LE: loop exit
PB: predicated region body
PF: predicated region fallthrough
CT: control target
= control target key end

     0   :  { %12 = vsyncpa [#allocation3], 0  ;;  %s518_s24 = smov [#allocation2]   ;;  %s707_s0 = inlined_call_operand.vmem [shape: f32[8,16], index: 0, kind: input, shape index: {}]   ;;  %s708_s1 = inlined_call_operand.hbm [shape: f32[16,128], index: 1, kind: input, shape index: {}]   ;;  %s709_s2 = inlined_call_operand.vmem [shape: f32[1,128], index: 2, kind: input, shape index: {}]   ;;  %s710_s3 = inlined_call_operand.vmem [shape: f32[128,128], index: 3, kind: input, shape index: {}]   ;;  %s711_s4 = inlined_call_operand.vmem [shape: f32[1,128], index: 4, kind: input, shape index: {}]   ;;  %s712_s5 = inlined_call_operand.vmem [shape: f32[128,4], index: 5, kind: input, shape index: {}]   ;;  %s713_s6 = inlined_call_operand.vmem [shape: f32[1,4], index: 6, kind: input, shape index: {}]   ;;  %s714_s7 = inlined_call_operand.vmem [shape: f32[8,4], index: 7, kind: output, shape index: {}]  }
   0x1   :  { %s20_s25 = sshll.u32 %s518_s24, 4  ;;  %s494_s28 = scalar_lea.hbm %s708_s1, 256  ;;  %s21_s25 = int_to_ptr.vmem [resolvable:$true] %s20_s25 }
   0x2   :  { %p495_p0 = scmp.ne.s32.totalorder %s708_s1, %s494_s28  ;;  %p498_p1 = scmp.lt.u32.totalorder %s494_s28, %s708_s1 }
   0x4   :  { %p500_p2 = pnand %p498_p1, %p495_p0 }
   0x6   :  { %503 = shalt.err (!%p500_p2)
}
   0x7   :  { %s504_s10 = scalar_lea.vmem %s21_s25, 256  ;;  %p509_p4 = scmp.lt.s32.totalorder %s21_s25, %s21_s25 }
   0x8   :  { %p505_p3 = scmp.ne.s32.totalorder %s21_s25, %s504_s10  ;;  %p510_p5 = scmp.lt.s32.totalorder %s504_s10, %s504_s10 }
   0xa   :  { %p511_p6 = por %p510_p5, %p509_p4 }
   0xc   :  { %p512_p7 = pnand %p511_p6, %p505_p3 }
   0xe   :  { %515 = shalt.err (!%p512_p7)
}
   0xf   :  { %s519_s11 = smov 128   ;;  %s520_s12 = smov 8  }
  0x10   :  { %26 = dma.hbm_to_vmem [thread:$0]  %s708_s1, 256, %s21_s25, [#allocation3], %s519_s11, %s519_s11, %s520_s12  }
  0x11   :  { %516 = dma.done.wait [#allocation3], 256  }
  0x12   :  { %517 = vsyncadd [#allocation3], 4294967040  ;;  %v521_v0 = vmov 0.0|0.0   ;;  %vm522_vm0 = vmmov 0   ;;  %v523_v1 = vmov 0.0   ;;  %v41_v2 = vld [vmem:[#allocation2] sm:$0xff] }
  0x13   :  { %437 = vmatprep.subr.bf16.mxu0 %v521_v0  ;;  %364 = vmatprep.mubr.msk.f32.mxu0 %vm522_vm0, %v523_v1  ;;  %v42_v3 = vld [vmem:[#allocation2 + $0x8] sm:$0xff]  ;;  %v125_v5 = vld [vmem:[%s710_s3] sm:$0xff]  ;;  %v127_v7 = vld [vmem:[%s710_s3 + $0x10] sm:$0xff]  ;;  %vm50_vm1 = vcmask 130048   ;;  %vm312_vm2 = vcmask 31744  }
  0x14   :  { %440 = vmatprep.subr.bf16.mxu1 %v521_v0  ;;  %399 = vmatprep.mubr.msk.f32.mxu1 %vm522_vm0, %v523_v1  ;;  %v438_v4 = vpack.c.bf16 %v42_v3, %v41_v2  ;;  %v126_v6 = vld [vmem:[%s710_s3 + $0x8] sm:$0xff]  ;;  %v128_v9 = vld [vmem:[%s710_s3 + $0x18] sm:$0xff]  ;;  %v40_v10 = vld [vmem:[%s707_s0] sm:$0xff] }
  0x15   :  { %v441_v8 = vpack.c.bf16 %v126_v6, %v125_v5  ;;  %v444_v11 = vpack.c.bf16 %v128_v9, %v127_v7  ;;  %v129_v12 = vld [vmem:[%s710_s3 + $0x20] sm:$0xff]  ;;  %v130_v13 = vld [vmem:[%s710_s3 + $0x28] sm:$0xff]  ;;  %v131_v15 = vld [vmem:[%s710_s3 + $0x30] sm:$0xff] }
  0x16   :  { %439 = vmatpush3.bf16.msra.mxu0 %v438_v4  ;;  %v447_v14 = vpack.c.bf16 %v130_v13, %v129_v12  ;;  %v132_v16 = vld [vmem:[%s710_s3 + $0x38] sm:$0xff]  ;;  %v133_v18 = vld [vmem:[%s710_s3 + $0x40] sm:$0xff]  ;;  %v134_v19 = vld [vmem:[%s710_s3 + $0x48] sm:$0xff] }
  0x17   :  { %442 = vmatpush3.bf16.msra.mxu1 %v441_v8  ;;  %464 = vmatprep.subr.bf16.mxu0 %v521_v0  ;;  %v450_v17 = vpack.c.bf16 %v132_v16, %v131_v15  ;;  %v453_v20 = vpack.c.bf16 %v134_v19, %v133_v18  ;;  %v135_v21 = vld [vmem:[%s710_s3 + $0x50] sm:$0xff]  ;;  %v136_v22 = vld [vmem:[%s710_s3 + $0x58] sm:$0xff]  ;;  %v137_v24 = vld [vmem:[%s710_s3 + $0x60] sm:$0xff] }
  0x18   :  { %443 = vmatprep.subr.bf16.mxu1 %v521_v0  ;;  %v456_v23 = vpack.c.bf16 %v136_v22, %v135_v21  ;;  %v138_v25 = vld [vmem:[%s710_s3 + $0x68] sm:$0xff]  ;;  %v139_v27 = vld [vmem:[%s710_s3 + $0x70] sm:$0xff]  ;;  %v140_v28 = vld [vmem:[%s710_s3 + $0x78] sm:$0xff] }
  0x19   :  { %365 = vmatmul.mubr.msk.f32.vlgmr.msra.gmra.mrb[0].mxu0 %vm50_vm1, %v40_v10  ;;  %v459_v26 = vpack.c.bf16 %v138_v25, %v137_v24  ;;  %v462_v29 = vpack.c.bf16 %v140_v28, %v139_v27  ;;  %v219_v30 = vld [vmem:[%s712_s5] sm:$0xff]  ;;  %v220_v31 = vld [vmem:[%s712_s5 + $0x8] sm:$0xff]  ;;  %v221_v32 = vld [vmem:[%s712_s5 + $0x10] sm:$0xff] }
  0x1a   :  { %434 = vmatprep.mubr.msk.f32.mxu0 %vm522_vm0, %v523_v1  ;;  %v465_v33 = vpack.c.bf16 %v220_v31, %v219_v30  ;;  %v222_v34 = vld [vmem:[%s712_s5 + $0x18] sm:$0xff]  ;;  %v223_v36 = vld [vmem:[%s712_s5 + $0x20] sm:$0xff]  ;;  %v224_v37 = vld [vmem:[%s712_s5 + $0x28] sm:$0xff] }
  0x1b   :  { %445 = vmatpush3.bf16.msra.mxu1 %v444_v11  ;;  %v468_v35 = vpack.c.bf16 %v222_v34, %v221_v32  ;;  %v471_v38 = vpack.c.bf16 %v224_v37, %v223_v36  ;;  %v225_v39 = vld [vmem:[%s712_s5 + $0x30] sm:$0xff]  ;;  %v226_v40 = vld [vmem:[%s712_s5 + $0x38] sm:$0xff]  ;;  %v227_v42 = vld [vmem:[%s712_s5 + $0x40] sm:$0xff] }
  0x1c   :  { %446 = vmatprep.subr.bf16.mxu1 %v521_v0  ;;  %466 = vmatpush3.bf16.msra.mxu0 %v465_v33  ;;  %v474_v41 = vpack.c.bf16 %v226_v40, %v225_v39  ;;  %v228_v43 = vld [vmem:[%s712_s5 + $0x48] sm:$0xff]  ;;  %v229_v45 = vld [vmem:[%s712_s5 + $0x50] sm:$0xff]  ;;  %v230_v46 = vld [vmem:[%s712_s5 + $0x58] sm:$0xff] }
  0x1d   :  { %467 = vmatprep.subr.bf16.mxu0 %v521_v0  ;;  %v477_v44 = vpack.c.bf16 %v228_v43, %v227_v42  ;;  %v480_v47 = vpack.c.bf16 %v230_v46, %v229_v45  ;;  %v231_v48 = vld [vmem:[%s712_s5 + $0x60] sm:$0xff]  ;;  %v232_v49 = vld [vmem:[%s712_s5 + $0x68] sm:$0xff]  ;;  %v233_v56 = vld [vmem:[%s712_s5 + $0x70] sm:$0xff] }
  0x1e   :  { %v483_v50 = vpack.c.bf16 %v232_v49, %v231_v48  ;;  %v319_v51 = vld [vmem:[%s709_s2] ss:$0 sm:$0xff]  ;;  %v234_v57 = vld [vmem:[%s712_s5 + $0x78] sm:$0xff] }
  0x1f   :  { %448 = vmatpush3.bf16.msra.mxu1 %v447_v14  ;;  %v486_v58 = vpack.c.bf16 %v234_v57, %v233_v56  ;;  %v321_v59 = vld [vmem:[%s711_s4] ss:$0 sm:$0xff] }
  0x20   :  { %449 = vmatprep.subr.bf16.mxu1 %v521_v0  ;;  %469 = vmatpush3.bf16.msra.mxu0 %v468_v35 }
  0x21   :  { %470 = vmatprep.subr.bf16.mxu0 %v521_v0 }
  0x23   :  { %451 = vmatpush3.bf16.msra.mxu1 %v450_v17 }
  0x24   :  { %452 = vmatprep.subr.bf16.mxu1 %v521_v0  ;;  %472 = vmatpush3.bf16.msra.mxu0 %v471_v38 }
  0x25   :  { %473 = vmatprep.subr.bf16.mxu0 %v521_v0 }
  0x27   :  { %454 = vmatpush3.bf16.msra.mxu1 %v453_v20 }
  0x28   :  { %455 = vmatprep.subr.bf16.mxu1 %v521_v0  ;;  %475 = vmatpush3.bf16.msra.mxu0 %v474_v41 }
  0x29   :  { %476 = vmatprep.subr.bf16.mxu0 %v521_v0 }
  0x2b   :  { %457 = vmatpush3.bf16.msra.mxu1 %v456_v23 }
  0x2c   :  { %458 = vmatprep.subr.bf16.mxu1 %v521_v0  ;;  %478 = vmatpush3.bf16.msra.mxu0 %v477_v44 }
  0x2d   :  { %479 = vmatprep.subr.bf16.mxu0 %v521_v0 }
  0x2f   :  { %460 = vmatpush3.bf16.msra.mxu1 %v459_v26 }
  0x30   :  { %461 = vmatprep.subr.bf16.mxu1 %v521_v0  ;;  %481 = vmatpush3.bf16.msra.mxu0 %v480_v47 }
  0x31   :  { %482 = vmatprep.subr.bf16.mxu0 %v521_v0 }
  0x33   :  { %463 = vmatpush3.bf16.msra.mxu1 %v462_v29 }
  0x34   :  { %484 = vmatpush3.bf16.msra.mxu0 %v483_v50 }
  0x35   :  { %485 = vmatprep.subr.bf16.mxu0 %v521_v0  ;;  %v322_v0 = vld [vmem:[%s713_s6] ss:$0 sm:$0xff] }
  0x38   :  { %487 = vmatpush3.bf16.msra.mxu0 %v486_v58 }
  0xec   :  { %v120_v52 = vpop.f32.mrb[0].mxu0 }
  0xed   :  { %v121_v53 = vadd.f32 %v319_v51, %v120_v52  ;;  %v366_v54 = vpop.f32.mrb[1].mxu0 }
  0xef   :  { %v124_v55 = vmax.f32 %v121_v53, 0.0 }
  0xf1   :  { %400 = vmatmul.mubr.f32.vlgmr.msra.gmra.mrb[0].mxu1 %v124_v55 }
 0x1c4   :  { %v214_v60 = vpop.f32.mrb[0].mxu1 }
 0x1c5   :  { %v215_v61 = vadd.f32 %v321_v59, %v214_v60  ;;  %v401_v62 = vpop.f32.mrb[1].mxu1 }
 0x1c7   :  { %v218_v63 = vmax.f32 %v215_v61, 0.0 }
 0x1c9   :  { %435 = vmatmul.mubr.f32.vlgmr.msra.gmra.mrb[2].mxu0 %v218_v63 }
 0x29c   :  { %v308_v1 = vpop.f32.mrb[2].mxu0 }
 0x29d   :  { %v309_v2 = vadd.f32 %v322_v0, %v308_v1  ;;  %v436_v3 = vpop.f32.mrb[3].mxu0 }
 0x29f   :  { %313 = vst.msk [vmem:[%s714_s7] sm:$0xff] %vm312_vm2, %v309_v2 }
 0x2a0   :  { %318 = vsyncpa [#allocation3], 1 }

</bundles_post_ra>
